<compile_context>
chip_gen: v7x
topology: tpu7x:2x2x1
jax: 0.10.0
libtpu: 0.0.40
codegen_flags: <defaults>
</compile_context>

<pallas_src>
import jax
import jax.numpy as jnp
from jax.experimental import pallas as pl
from jax.experimental.pallas import tpu as pltpu

LN_EPS = 1e-5  # nn.LayerNorm default


def _round_up(x, m):
    return ((x + m - 1) // m) * m


def _vmem_limit_bytes():
    """Generation-aware scoped-VMEM limit: ~75% of physical, capped at 100 MiB."""
    try:
        cap = pltpu.get_tpu_info().vmem_capacity_bytes
    except Exception:
        cap = 64 * 1024 * 1024  # conservative fallback (v7x per-TC VMEM)
    return max(32 * 1024 * 1024, min(int(cap * 3 // 4), 100 * 1024 * 1024))


def _layernorm(xf, gamma, beta, d_true, dm_p):
    """Masked two-pass LayerNorm over the true (unpadded) feature width, in f32."""
    inv_d = 1.0 / float(d_true)
    mean = jnp.sum(xf, axis=-1, keepdims=True) * inv_d  # padding cols are zero
    xc = xf - mean
    if dm_p != d_true:
        mask = jax.lax.broadcasted_iota(jnp.int32, xf.shape, 1) < d_true
        xc = jnp.where(mask, xc, 0.0)  # keep padding out of the variance
    var = jnp.sum(xc * xc, axis=-1, keepdims=True) * inv_d
    xn = xc * jax.lax.rsqrt(var + LN_EPS)
    return xn * gamma + beta


def _make_fused_kernel(d_true, dm_p):
    """Single-grid-axis kernel: full W1/W2 resident in VMEM, DMA'd once."""

    def kernel(x_ref, g_ref, bln_ref, w1_ref, b1_ref, w2_ref, b2_ref, o_ref):
        xf = x_ref[...].astype(jnp.float32)
        xn = _layernorm(xf, g_ref[...], bln_ref[...], d_true, dm_p)
        h = jnp.dot(xn.astype(jnp.bfloat16), w1_ref[...],
                    preferred_element_type=jnp.float32)
        h = h + b1_ref[...]
        h = h * jax.nn.sigmoid(h)  # SiLU; dropout1 = identity at inference
        y = jnp.dot(h.astype(jnp.bfloat16), w2_ref[...],
                    preferred_element_type=jnp.float32)
        y = y + b2_ref[...] + xf   # dropout2 = identity; add bias + residual
        o_ref[...] = y.astype(o_ref.dtype)

    return kernel


def _make_tiled_kernel(d_true, dm_p):
    """Two-axis kernel: (token tiles [parallel], d_ff tiles [arbitrary/reduction]).
    fc2 partials accumulate directly into the resident f32 output block."""

    def kernel(x_ref, g_ref, bln_ref, w1_ref, b1_ref, w2_ref, b2_ref, o_ref, xn_ref):
        k = pl.program_id(1)

        @pl.when(k == 0)
        def _():
            xf = x_ref[...].astype(jnp.float32)
            xn = _layernorm(xf, g_ref[...], bln_ref[...], d_true, dm_p)
            xn_ref[...] = xn.astype(jnp.bfloat16)     # bf16 MXU operand, resident across k
            o_ref[...] = jnp.zeros_like(o_ref)        # f32 accumulator = output block

        h = jnp.dot(xn_ref[...], w1_ref[...], preferred_element_type=jnp.float32)
        h = h + b1_ref[...]
        h = h * jax.nn.sigmoid(h)                     # SiLU; dropout1 = identity
        o_ref[...] += jnp.dot(h.astype(jnp.bfloat16), w2_ref[...],
                              preferred_element_type=jnp.float32).astype(o_ref.dtype)

        @pl.when(k == pl.num_programs(1) - 1)
        def _():
            # dropout2 = identity; add bias + residual (x block is resident across k)
            o_ref[...] = (o_ref[...] + b2_ref[...].astype(o_ref.dtype)
                          + x_ref[...].astype(o_ref.dtype))

    return kernel


def prepare_ffn_params(params, *, tff=2048):
    """Pad to lane-dense shapes and cast weights to bf16 ONCE (outside the hot path)."""
    d_model, d_ff = params["w1"].shape
    dm_p = _round_up(d_model, 128)
    tff = min(tff, _round_up(d_ff, 128))
    dff_p = _round_up(d_ff, tff)
    f32 = jnp.float32
    return {
        "d_model": d_model, "d_ff": d_ff, "dm_p": dm_p, "dff_p": dff_p, "tff": tff,
        "gamma": jnp.pad(params["gamma"].astype(f32), (0, dm_p - d_model)).reshape(1, dm_p),
        "beta": jnp.pad(params["beta"].astype(f32), (0, dm_p - d_model)).reshape(1, dm_p),
        "w1": jnp.pad(params["w1"], ((0, dm_p - d_model), (0, dff_p - d_ff))).astype(jnp.bfloat16),
        "b1": jnp.pad(params["b1"].astype(f32), (0, dff_p - d_ff)).reshape(1, dff_p),
        "w2": jnp.pad(params["w2"], ((0, dff_p - d_ff), (0, dm_p - d_model))).astype(jnp.bfloat16),
        "b2": jnp.pad(params["b2"].astype(f32), (0, dm_p - d_model)).reshape(1, dm_p),
    }


def feed_forward_module(x, prepped, *, tm=512, force_tiled=False):
    """x: (batch, seq, d_model). prepped: output of prepare_ffn_params."""
    batch, seq, d_model = x.shape
    assert d_model == prepped["d_model"]
    dm_p, dff_p, tff = prepped["dm_p"], prepped["dff_p"], prepped["tff"]
    N = batch * seq

    vmem_limit = _vmem_limit_bytes()
    budget = int(vmem_limit * 0.8)

    tm = max(8, min(tm, _round_up(N, 8)))

    # --- Path choice: fused (weights VMEM-resident, DMA'd once) vs d_ff-tiled ---
    w_bytes = 2 * dm_p * dff_p * 2                    # W1 + W2 in bf16
    fused_bytes = (2 * w_bytes                        # weights (assume double-buffered)
                   + 4 * tm * dm_p * 4                # x + out tiles (double-buffered f32)
                   + tm * dff_p * 6                   # fc1/SiLU intermediate (f32 + bf16)
                   + tm * dm_p * 12)                  # LN temps, bf16 xn, residual
    use_fused = (not force_tiled) and fused_bytes <= budget

    if not use_fused:
        def tiled_bytes(tm_, tff_):
            return (4 * tm_ * dm_p * 4                # x + out tiles (double-buffered)
                    + 4 * dm_p * tff_ * 2             # W1 + W2 tiles (double-buffered bf16)
                    + tm_ * dm_p * 2                  # xn scratch (bf16)
                    + tm_ * tff_ * 6                  # h temps
                    + tm_ * dm_p * 12)                # misc f32 temps
        # Shrink tff first (keeps the arithmetic intensity set by tm), then tm.
        while tiled_bytes(tm, tff) > budget:
            if tff >= 512 and tff % 256 == 0:
                tff //= 2
            elif tm >= 128:
                tm //= 2
            else:
                break

    n_p = _round_up(N, tm)
    # Megacore (v7x has 2 TCs): keep the parallel token axis >= 2 tiles when possible.
    if n_p // tm == 1 and tm >= 16 and (tm // 2) % 8 == 0:
        tm //= 2
        n_p = _round_up(N, tm)

    x2d = x.reshape(N, d_model)
    if n_p != N or dm_p != d_model:
        x2d = jnp.pad(x2d, ((0, n_p - N), (0, dm_p - d_model)))
    x2d = x2d.astype(jnp.float32)

    flops = 4 * n_p * dm_p * dff_p
    args = (x2d, prepped["gamma"], prepped["beta"], prepped["w1"], prepped["b1"],
            prepped["w2"], prepped["b2"])

    if use_fused:
        grid_spec = pltpu.PrefetchScalarGridSpec(
            num_scalar_prefetch=0,
            grid=(n_p // tm,),
            in_specs=[
                pl.BlockSpec((tm, dm_p), lambda i: (i, 0)),      # x tile
                pl.BlockSpec((1, dm_p), lambda i: (0, 0)),       # gamma
                pl.BlockSpec((1, dm_p), lambda i: (0, 0)),       # beta
                pl.BlockSpec((dm_p, dff_p), lambda i: (0, 0)),   # W1 (resident, DMA'd once)
                pl.BlockSpec((1, dff_p), lambda i: (0, 0)),      # b1
                pl.BlockSpec((dff_p, dm_p), lambda i: (0, 0)),   # W2 (resident, DMA'd once)
                pl.BlockSpec((1, dm_p), lambda i: (0, 0)),       # b2
            ],
            out_specs=pl.BlockSpec((tm, dm_p), lambda i: (i, 0)),
        )
        kernel = _make_fused_kernel(d_model, dm_p)
        dims = ("parallel",)
        bytes_accessed = 2 * n_p * dm_p * 4 + w_bytes + (4 * dm_p + dff_p) * 4
    else:
        grid_spec = pltpu.PrefetchScalarGridSpec(
            num_scalar_prefetch=0,
            grid=(n_p // tm, dff_p // tff),
            in_specs=[
                pl.BlockSpec((tm, dm_p), lambda i, k: (i, 0)),   # x tile (resident across k)
                pl.BlockSpec((1, dm_p), lambda i, k: (0, 0)),    # gamma
                pl.BlockSpec((1, dm_p), lambda i, k: (0, 0)),    # beta
                pl.BlockSpec((dm_p, tff), lambda i, k: (0, k)),  # W1 column tile
                pl.BlockSpec((1, tff), lambda i, k: (0, k)),     # b1 tile
                pl.BlockSpec((tff, dm_p), lambda i, k: (k, 0)),  # W2 row tile
                pl.BlockSpec((1, dm_p), lambda i, k: (0, 0)),    # b2
            ],
            out_specs=pl.BlockSpec((tm, dm_p), lambda i, k: (i, 0)),
            scratch_shapes=[pltpu.VMEM((tm, dm_p), jnp.bfloat16)],  # LN output (bf16 operand)
        )
        kernel = _make_tiled_kernel(d_model, dm_p)
        dims = ("parallel", "arbitrary")
        # Weights are re-streamed once per token tile in this path.
        bytes_accessed = (2 * n_p * dm_p * 4 + (n_p // tm) * w_bytes
                          + (4 * dm_p + dff_p) * 4)

    out2d = pl.pallas_call(
        kernel,
        out_shape=jax.ShapeDtypeStruct((n_p, dm_p), jnp.float32),
        grid_spec=grid_spec,
        compiler_params=pltpu.CompilerParams(
            dimension_semantics=dims,
            vmem_limit_bytes=vmem_limit,
        ),
        cost_estimate=pl.CostEstimate(
            flops=flops, transcendentals=n_p * dff_p, bytes_accessed=bytes_accessed),
    )(*args)

    return out2d[:N, :d_model].reshape(batch, seq, d_model).astype(x.dtype)


def init_params(key, d_model, d_ff):
    """Deterministic synthetic init mimicking PyTorch Linear/LayerNorm shapes."""
    k1, k2, k3, k4 = jax.random.split(key, 4)
    bound1 = 1.0 / (d_model ** 0.5)
    bound2 = 1.0 / (d_ff ** 0.5)
    return {
        "gamma": jnp.ones((d_model,), jnp.float32),
        "beta": jnp.zeros((d_model,), jnp.float32),
        # stored as (in, out) so the kernel does x @ W (== PyTorch x @ W.T)
        "w1": jax.random.uniform(k1, (d_model, d_ff), jnp.float32, -bound1, bound1),
        "b1": jax.random.uniform(k2, (d_ff,), jnp.float32, -bound1, bound1),
        "w2": jax.random.uniform(k3, (d_ff, d_model), jnp.float32, -bound2, bound2),
        "b2": jax.random.uniform(k4, (d_model,), jnp.float32, -bound2, bound2),
    }


def feed_forward_ref(x, params):
    """Pure-JAX f32 reference for correctness check."""
    mean = jnp.mean(x, axis=-1, keepdims=True)
    var = jnp.mean(jnp.square(x - mean), axis=-1, keepdims=True)
    xn = (x - mean) * jax.lax.rsqrt(var + LN_EPS)
    xn = xn * params["gamma"] + params["beta"]
    h = xn @ params["w1"] + params["b1"]
    h = h * jax.nn.sigmoid(h)
    y = h @ params["w2"] + params["b2"]
    return y + x


def _check(x, params, *, force_tiled=False, tff=2048, atol=2e-2, rtol=2e-2):
    # NOTE: bf16 weights / bf16 MXU operands vs a full-f32 reference -> loose tolerance
    # (intentional inference precision contract).
    prepped = prepare_ffn_params(params, tff=tff)
    out = jax.block_until_ready(feed_forward_module(x, prepped, force_tiled=force_tiled))
    ref = feed_forward_ref(x, params)
    assert out.shape == x.shape
    max_err = float(jnp.max(jnp.abs(out - ref)))
    assert jnp.allclose(out, ref, atol=atol, rtol=rtol), (
        f"mismatch vs reference, max abs err={max_err}")
    return out


# TODO(synk): training-mode dropout (stochastic masking via pltpu.prng_*) not implemented;
# eval-mode (identity) semantics only.

if __name__ == "__main__":
    key = jax.random.PRNGKey(0)
    kx1, kp1, kx2, kp2 = jax.random.split(key, 4)

    # Case 1: lane-dense dims (d_model multiple of 128); weights fit VMEM -> fused path.
    batch, seq, d_model = 2, 8, 128
    x1 = jax.random.normal(kx1, (batch, seq, d_model), jnp.float32)
    p1 = init_params(kp1, d_model, 4 * d_model)
    _check(x1, p1)

    # Case 2: ragged dims exercise the token/feature zero-padding + masked-LN path.
    batch2, seq2, d_model2 = 2, 10, 96
    x2 = jax.random.normal(kx2, (batch2, seq2, d_model2), jnp.float32)
    p2 = init_params(kp2, d_model2, 4 * d_model2)
    _check(x2, p2)

    # Case 3: force the d_ff-tiled (reduction-axis) path with 2 k-steps to exercise the
    # resident-output accumulation used for large models that exceed the VMEM budget.
    _check(x1, p1, force_tiled=True, tff=256)

    print("KERNEL_OK")
</pallas_src>

<mosaic_0001>
module attributes {stable_mosaic.version = 11 : i64} {
  func.func @kernel(%arg0: i32, %arg1: memref<8x128xf32, #tpu.memory_space<vmem>>, %arg2: memref<1x128xf32, #tpu.memory_space<vmem>>, %arg3: memref<1x128xf32, #tpu.memory_space<vmem>>, %arg4: memref<128x512xbf16, #tpu.memory_space<vmem>>, %arg5: memref<1x512xf32, #tpu.memory_space<vmem>>, %arg6: memref<512x128xbf16, #tpu.memory_space<vmem>>, %arg7: memref<1x128xf32, #tpu.memory_space<vmem>>, %arg8: memref<8x128xf32, #tpu.memory_space<vmem>>) attributes {dimension_semantics = [#tpu.dimension_semantics<parallel>], iteration_bounds = array<i64: 2>, scalar_prefetch = 0 : i64, scratch_operands = 0 : i64, tpu.core_type = #tpu.core_type<tc>, window_params = [{transform_indices = @transform_0, window_bounds = array<i64: 8, 128>}, {pipeline_mode = #tpu.pipeline_mode<synchronous>, transform_indices = @transform_1, window_bounds = array<i64: 1, 128>}, {pipeline_mode = #tpu.pipeline_mode<synchronous>, transform_indices = @transform_2, window_bounds = array<i64: 1, 128>}, {pipeline_mode = #tpu.pipeline_mode<synchronous>, transform_indices = @transform_3, window_bounds = array<i64: 128, 512>}, {pipeline_mode = #tpu.pipeline_mode<synchronous>, transform_indices = @transform_4, window_bounds = array<i64: 1, 512>}, {pipeline_mode = #tpu.pipeline_mode<synchronous>, transform_indices = @transform_5, window_bounds = array<i64: 512, 128>}, {pipeline_mode = #tpu.pipeline_mode<synchronous>, transform_indices = @transform_6, window_bounds = array<i64: 1, 128>}, {transform_indices = @transform_7, window_bounds = array<i64: 8, 128>}]} {
    %c0 = arith.constant 0 : index
    %c0_0 = arith.constant 0 : index
    %0 = vector.load %arg1[%c0, %c0_0] : memref<8x128xf32, #tpu.memory_space<vmem>>, vector<8x128xf32>
    %c0_1 = arith.constant 0 : index
    %c0_2 = arith.constant 0 : index
    %1 = vector.load %arg2[%c0_1, %c0_2] : memref<1x128xf32, #tpu.memory_space<vmem>>, vector<1x128xf32>
    %c0_3 = arith.constant 0 : index
    %c0_4 = arith.constant 0 : index
    %2 = vector.load %arg3[%c0_3, %c0_4] : memref<1x128xf32, #tpu.memory_space<vmem>>, vector<1x128xf32>
    %cst = arith.constant dense<0.000000e+00> : vector<8xf32>
    %3 = vector.multi_reduction <add>, %0, %cst [1] : vector<8x128xf32> to vector<8xf32>
    %4 = vector.shape_cast %3 : vector<8xf32> to vector<8x1xf32>
    %cst_5 = arith.constant 7.812500e-03 : f32
    %5 = vector.broadcast %cst_5 : f32 to vector<8x1xf32>
    %6 = arith.mulf %4, %5 : vector<8x1xf32>
    %7 = vector.broadcast %6 : vector<8x1xf32> to vector<8x128xf32>
    %8 = arith.subf %0, %7 : vector<8x128xf32>
    %9 = arith.mulf %8, %8 : vector<8x128xf32>
    %cst_6 = arith.constant dense<0.000000e+00> : vector<8xf32>
    %10 = vector.multi_reduction <add>, %9, %cst_6 [1] : vector<8x128xf32> to vector<8xf32>
    %11 = vector.shape_cast %10 : vector<8xf32> to vector<8x1xf32>
    %cst_7 = arith.constant 7.812500e-03 : f32
    %12 = vector.broadcast %cst_7 : f32 to vector<8x1xf32>
    %13 = arith.mulf %11, %12 : vector<8x1xf32>
    %cst_8 = arith.constant 9.99999974E-6 : f32
    %14 = vector.broadcast %cst_8 : f32 to vector<8x1xf32>
    %15 = arith.addf %13, %14 : vector<8x1xf32>
    %16 = math.rsqrt %15 : vector<8x1xf32>
    %17 = vector.broadcast %16 : vector<8x1xf32> to vector<8x128xf32>
    %18 = arith.mulf %8, %17 : vector<8x128xf32>
    %19 = vector.broadcast %1 : vector<1x128xf32> to vector<8x128xf32>
    %20 = arith.mulf %18, %19 : vector<8x128xf32>
    %21 = vector.broadcast %2 : vector<1x128xf32> to vector<8x128xf32>
    %22 = arith.addf %20, %21 : vector<8x128xf32>
    %23 = arith.truncf %22 : vector<8x128xf32> to vector<8x128xbf16>
    %c0_9 = arith.constant 0 : index
    %c0_10 = arith.constant 0 : index
    %24 = vector.load %arg4[%c0_9, %c0_10] : memref<128x512xbf16, #tpu.memory_space<vmem>>, vector<128x512xbf16>
    %cst_11 = arith.constant dense<0.000000e+00> : vector<8x512xf32>
    %25 = tpu.matmul %23, %24, %cst_11 {dimension_numbers = #tpu.dot_dimension_numbers<[1], [0], [0], [1], [0, 0, 1, 1], [], []>} : vector<8x128xbf16>, vector<128x512xbf16>, vector<8x512xf32> -> vector<8x512xf32>
    %c0_12 = arith.constant 0 : index
    %c0_13 = arith.constant 0 : index
    %26 = vector.load %arg5[%c0_12, %c0_13] : memref<1x512xf32, #tpu.memory_space<vmem>>, vector<1x512xf32>
    %27 = vector.broadcast %26 : vector<1x512xf32> to vector<8x512xf32>
    %28 = arith.addf %25, %27 : vector<8x512xf32>
    %29 = arith.negf %28 : vector<8x512xf32>
    %30 = math.exp %29 : vector<8x512xf32>
    %cst_14 = arith.constant 1.000000e+00 : f32
    %31 = vector.broadcast %cst_14 : f32 to vector<8x512xf32>
    %32 = arith.addf %31, %30 : vector<8x512xf32>
    %33 = arith.divf %31, %32 : vector<8x512xf32>
    %34 = arith.mulf %28, %33 : vector<8x512xf32>
    %35 = arith.truncf %34 : vector<8x512xf32> to vector<8x512xbf16>
    %c0_15 = arith.constant 0 : index
    %c0_16 = arith.constant 0 : index
    %36 = vector.load %arg6[%c0_15, %c0_16] : memref<512x128xbf16, #tpu.memory_space<vmem>>, vector<512x128xbf16>
    %cst_17 = arith.constant dense<0.000000e+00> : vector<8x128xf32>
    %37 = tpu.matmul %35, %36, %cst_17 {dimension_numbers = #tpu.dot_dimension_numbers<[1], [0], [0], [1], [0, 0, 1, 1], [], []>} : vector<8x512xbf16>, vector<512x128xbf16>, vector<8x128xf32> -> vector<8x128xf32>
    %c0_18 = arith.constant 0 : index
    %c0_19 = arith.constant 0 : index
    %38 = vector.load %arg7[%c0_18, %c0_19] : memref<1x128xf32, #tpu.memory_space<vmem>>, vector<1x128xf32>
    %39 = vector.broadcast %38 : vector<1x128xf32> to vector<8x128xf32>
    %40 = arith.addf %37, %39 : vector<8x128xf32>
    %41 = arith.addf %40, %0 : vector<8x128xf32>
    %c0_20 = arith.constant 0 : index
    %c0_21 = arith.constant 0 : index
    %42 = vector.load %arg8[%c0_20, %c0_21] : memref<8x128xf32, #tpu.memory_space<vmem>>, vector<8x128xf32>
    tpu.vector_store %arg8[%c0_20, %c0_21], %41 {strides = array<i32>} : memref<8x128xf32, #tpu.memory_space<vmem>>, vector<8x128xf32>,
    return
  }
  func.func @transform_0(%arg0: i32) -> (i32, i32) {
    %c0_i32 = arith.constant 0 : i32
    %c0_i32_0 = arith.constant 0 : i32
    return %arg0, %c0_i32 : i32, i32
  }
  func.func @transform_1(%arg0: i32) -> (i32, i32) {
    %c0_i32 = arith.constant 0 : i32
    %c0_i32_0 = arith.constant 0 : i32
    %c0_i32_1 = arith.constant 0 : i32
    return %c0_i32, %c0_i32_0 : i32, i32
  }
  func.func @transform_2(%arg0: i32) -> (i32, i32) {
    %c0_i32 = arith.constant 0 : i32
    %c0_i32_0 = arith.constant 0 : i32
    %c0_i32_1 = arith.constant 0 : i32
    return %c0_i32, %c0_i32_0 : i32, i32
  }
  func.func @transform_3(%arg0: i32) -> (i32, i32) {
    %c0_i32 = arith.constant 0 : i32
    %c0_i32_0 = arith.constant 0 : i32
    %c0_i32_1 = arith.constant 0 : i32
    return %c0_i32, %c0_i32_0 : i32, i32
  }
  func.func @transform_4(%arg0: i32) -> (i32, i32) {
    %c0_i32 = arith.constant 0 : i32
    %c0_i32_0 = arith.constant 0 : i32
    %c0_i32_1 = arith.constant 0 : i32
    return %c0_i32, %c0_i32_0 : i32, i32
  }
  func.func @transform_5(%arg0: i32) -> (i32, i32) {
    %c0_i32 = arith.constant 0 : i32
    %c0_i32_0 = arith.constant 0 : i32
    %c0_i32_1 = arith.constant 0 : i32
    return %c0_i32, %c0_i32_0 : i32, i32
  }
  func.func @transform_6(%arg0: i32) -> (i32, i32) {
    %c0_i32 = arith.constant 0 : i32
    %c0_i32_0 = arith.constant 0 : i32
    %c0_i32_1 = arith.constant 0 : i32
    return %c0_i32, %c0_i32_0 : i32, i32
  }
  func.func @transform_7(%arg0: i32) -> (i32, i32) {
    %c0_i32 = arith.constant 0 : i32
    %c0_i32_0 = arith.constant 0 : i32
    return %arg0, %c0_i32 : i32, i32
  }
}

</mosaic_0001>

<bundles_post_ra>
// kernel: tpu_custom_call.1
= control target key start
LH: loop header
LB: loop body
LE: loop exit
PB: predicated region body
PF: predicated region fallthrough
CT: control target
= control target key end

     0   :  { %12 = vsyncpa [#allocation3], 0  ;;  %s1887_s0 = inlined_call_operand.hbm [shape: f32[16,128], index: 0, kind: input, shape index: {}]   ;;  %s1888_s1 = inlined_call_operand.vmem [shape: f32[1,128], index: 1, kind: input, shape index: {}]   ;;  %s1889_s2 = inlined_call_operand.vmem [shape: f32[1,128], index: 2, kind: input, shape index: {}]   ;;  %s1890_s3 = inlined_call_operand.hbm [shape: bf16[128,512], index: 3, kind: input, shape index: {}]   ;;  %s1891_s4 = inlined_call_operand.vmem [shape: f32[1,512], index: 4, kind: input, shape index: {}]   ;;  %s1892_s5 = inlined_call_operand.hbm [shape: bf16[512,128], index: 5, kind: input, shape index: {}]   ;;  %s1893_s6 = inlined_call_operand.vmem [shape: f32[1,128], index: 6, kind: input, shape index: {}]   ;;  %s1894_s7 = inlined_call_operand.hbm [shape: f32[16,128], index: 7, kind: output, shape index: {}]  }
   0x1   :  { %14 = vsyncpa [#allocation3 + $0x1], 0 }
   0x2   :  { %15 = vsyncpa [#allocation6], 0 }
   0x3   :  { %16 = vsyncpa [#allocation4], 0 }
   0x4   :  { %18 = vsyncpa [#allocation4 + $0x1], 0  ;;  %s1637_s24 = smov 0   ;;  %s1639_s25 = smov 0  }
   0x5   :  { %s1641_s26 = smov 0   ;;  %s1643_s27 = smov 0  }
   0x6 LB: > { %s1658_s28 = sadd.s32 4294967295, %s1586_s27   ;;  %s1129_s29 = sadd.s32 4294967294, %s1586_s27   ;;  %s1586_s27 = sphi %s1643_s27, %s1914_s27   ;;  %s1582_s26 = sphi %s1641_s26, %s1913_s26   ;;  %s1578_s25 = sphi %s1639_s25, %s1912_s25   ;;  %s1574_s24 = sphi %s1637_s24, %s1911_s24  }
   0x7   : > { %p44_p0 = scmp.ne.s32.totalorder %s1578_s25, %s1574_s24  ;;  %p1895_p1 = scmp.eq.s32.totalorder %s1658_s28, 0 }
   0x8   : > { %p200_p3 = scmp.eq.s32.totalorder %s1129_s29, 1  ;;  %p1130_p5 = scmp.ge.s32.totalorder %s1586_s27, 1 }
   0x9   : > { %p1667_p4 = por %p1895_p1, %p44_p0  ;;  %p207_p7 = scmp.lt.s32.totalorder %s1586_s27, 3 }
   0xa   : > { %p1672_p6 = por %p200_p3, %p44_p0  ;;  %s1588_s10 = smov [#allocation5]  }
   0xb   : > { %s1898_s30 = scalar_select %p1667_p4, 1, 0 }
   0xc   : > { %s1899_s8 = scalar_select %p1672_p6, 1, 0 }
   0xd   : > { %p1677_p8 = pnand %p1130_p5, %p207_p7  ;;  %s225_s11 = sshll.u32 %s1588_s10, 4  ;;  %s1681_s11 = int_to_ptr.vmem [resolvable:$true] %s225_s11 }
   0xe   : > { %s1589_s13 = smov [#allocation7]   ;;  %s1430_s17 = scalar_lea.hbm %s1890_s3, 4096 }
   0xf   : > { %p1272_p9 = pneg %p1677_p8  ;;  %s241_s14 = sshll.u32 %s1589_s13, 4  ;;  %s1692_s14 = int_to_ptr.vmem [resolvable:$true] %s241_s14 }
  0x10   : > { %p1431_p12 = scmp.ne.s32.totalorder %s1890_s3, %s1430_s17  ;;  %p1437_p5 = scmp.lt.u32.totalorder %s1430_s17, %s1890_s3 }
  0x11   : > { %p1688_p11 = pnand %p1272_p9, %p1895_p1 }
  0x13   : > { %p1432_p13 = pneg %p1688_p11 }
  0x15   : > { %p1433_p0 = pnand %p1432_p13, %p1431_p12 }
  0x17   : > { %p1434_p3 = pneg %p1433_p0 }
  0x19   : > { %p1439_p7 = pnand %p1437_p5, %p1434_p3 }
  0x1b   : > { %1442 = shalt.err (!%p1439_p7)
}
  0x1c   : > { %s1443_s22 = scalar_lea.vmem %s1681_s11, 4096  ;;  %p1451_p2 = scmp.lt.s32.totalorder %s1681_s11, %s1681_s11 }
  0x1d   : > { %p1444_p9 = scmp.ne.s32.totalorder %s1681_s11, %s1443_s22  ;;  %p1452_p12 = scmp.lt.s32.totalorder %s1443_s22, %s1443_s22 }
  0x1f   : > { %p1446_p10 = pnand %p1444_p9, %p1432_p13  ;;  %p1453_p0 = por %p1452_p12, %p1451_p2 }
  0x21   : > { %p1447_p1 = pneg %p1446_p10 }
  0x23   : > { %p1454_p6 = pnand %p1453_p0, %p1447_p1 }
  0x25   : > { %1457 = shalt.err (!%p1454_p6)
}
  0x26   : > { %s1590_s23 = smov 256   ;;  %s1591_s29 = smov 16  }
  0x27   : > { %1275 = dma.hbm_to_vmem [thread:$0]  (!%p1688_p11), %s1890_s3, 4096, %s1681_s11, [#allocation6], %s1590_s23, %s1590_s23, %s1591_s29  }
  0x28   : > { %s1458_s17 = scalar_lea.hbm %s1892_s5, 4096 }
  0x29   : > { %p1459_p2 = scmp.ne.s32.totalorder %s1892_s5, %s1458_s17  ;;  %p1465_p10 = scmp.lt.u32.totalorder %s1458_s17, %s1892_s5 }
  0x2b   : > { %p1461_p1 = pnand %p1459_p2, %p1432_p13 }
  0x2d   : > { %p1462_p6 = pneg %p1461_p1 }
  0x2f   : > { %p1467_p3 = pnand %p1465_p10, %p1462_p6 }
  0x31   : > { %1470 = shalt.err (!%p1467_p3)
}
  0x32   : > { %s1471_s11 = scalar_lea.vmem %s1692_s14, 4096  ;;  %p1479_p12 = scmp.lt.s32.totalorder %s1692_s14, %s1692_s14 }
  0x33   : > { %p1472_p5 = scmp.ne.s32.totalorder %s1692_s14, %s1471_s11  ;;  %p1480_p0 = scmp.lt.s32.totalorder %s1471_s11, %s1471_s11 }
  0x35   : > { %p1474_p7 = pnand %p1472_p5, %p1432_p13  ;;  %p1481_p2 = por %p1480_p0, %p1479_p12 }
  0x37   : > { %p1475_p9 = pneg %p1474_p7 }
  0x39   : > { %p1482_p1 = pnand %p1481_p2, %p1475_p9 }
  0x3b   : > { %1485 = shalt.err (!%p1482_p1)
}
  0x3c   : > { %s1592_s22 = smov 64   ;;  %s1593_s23 = smov 4  }
  0x3d   : > { %1278 = dma.hbm_to_vmem [thread:$0]  (!%p1688_p11), %s1892_s5, 4096, %s1692_s14, [#allocation6], %s1592_s22, %s1592_s22, %s1593_s23  }
  0x3e   : > { %s1747_s13 = sadd.s32 1, %s1586_s27   ;;  %s31_s16 = sadd.s32 1, %s1582_s26 }
  0x3f   : > { %s28_s15 = ssub.s32 %s1586_s27, %s1747_s13  ;;  %p38_p6 = scmp.ne.s32.totalorder %s1582_s26, %s1578_s25 }
  0x40   : > { %p29_p13 = scmp.eq.s32.totalorder %s28_s15, 0  ;;  %p39_p10 = scmp.eq.s32.totalorder %s1586_s27, 0 }
  0x41   : > { %p1902_p5 = scmp.eq.s32.totalorder %s1658_s28, 1  ;;  %p1289_p9 = scmp.lt.s32.totalorder %s1586_s27, 2 }
  0x42   : > { %s1756_s17 = scalar_select %p29_p13, %s1582_s26, %s31_s16  }
  0x43   : > { %p40_p3 = por %p39_p10, %p38_p6  ;;  %p1760_p7 = por %p1902_p5, %p38_p6 }
  0x44   : > { %s258_s12 = sand.u32 1, %s1582_s26   ;;  %s1135_s14 = sshll.u32 %s1586_s27, 7 }
  0x45   : > { %s1903_s18 = scalar_select %p1760_p7, 1, 0 }
  0x46   : > { %s1134_s19 = sshll.u32 %s258_s12, 3  ;;  %s1770_s11 = scalar_lea.hbm %s1887_s0, %s1135_s14 }
  0x47   : > { %s262_s22 = scalar_lea.vmem [#allocation2], %s1134_s19  ;;  %p1774_p11 = pnand %p1289_p9, %p40_p3 }
  0x48   : > { %s269_s23 = sshll.u32 %s262_s22, 4  ;;  %s259_s10 = scalar_lea.sflag [#allocation3], %s258_s12  ;;  %s1772_s23 = int_to_ptr.vmem [resolvable:$true] %s269_s23 }
  0x49   : > { %s1486_s15 = scalar_lea.hbm %s1770_s11, 128  ;;  %p1488_p0 = pneg %p1774_p11 }
  0x4a   : > { %p1487_p12 = scmp.ne.s32.totalorder %s1770_s11, %s1486_s15  ;;  %s1491_s14 = scalar_lea.hbm %s1887_s0, 256 }
  0x4b   : > { %p1492_p13 = scmp.lt.u32.totalorder %s1770_s11, %s1887_s0  ;;  %p1493_p6 = scmp.lt.u32.totalorder %s1491_s14, %s1486_s15 }
  0x4c   : > { %p1489_p2 = pnand %p1488_p0, %p1487_p12  ;;  %p1495_p3 = scmp.lt.u32.totalorder %s1486_s15, %s1770_s11 }
  0x4d   : > { %p1494_p10 = por %p1493_p6, %p1492_p13 }
  0x4e   : > { %p1490_p1 = pneg %p1489_p2 }
  0x4f   : > { %p1496_p5 = por %p1495_p3, %p1494_p10 }
  0x51   : > { %p1497_p9 = pnand %p1496_p5, %p1490_p1 }
  0x53   : > { %1500 = shalt.err (!%p1497_p9)
}
  0x54   : > { %s1501_s12 = scalar_lea.vmem %s1772_s23, 128  ;;  %s1594_s22 = smov [#allocation2]  }
  0x55   : > { %p1502_p12 = scmp.ne.s32.totalorder %s1772_s23, %s1501_s12  ;;  %s1506_s16 = sshll.u32 %s1594_s22, 4  ;;  %s1507_s16 = int_to_ptr.vmem [resolvable:$false] %s1506_s16 }
  0x56   : > { %s1508_s19 = scalar_lea.vmem %s1507_s16, 256  ;;  %p1509_p4 = scmp.lt.s32.totalorder %s1772_s23, %s1507_s16 }
  0x57   : > { %p1504_p2 = pnand %p1502_p12, %p1488_p0  ;;  %p1510_p13 = scmp.lt.s32.totalorder %s1508_s19, %s1501_s12 }
  0x59   : > { %p1505_p7 = pneg %p1504_p2  ;;  %p1511_p6 = por %p1510_p13, %p1509_p4 }
  0x5b   : > { %p1512_p10 = pnand %p1511_p6, %p1505_p7 }
  0x5d   : > { %1515 = shalt.err (!%p1512_p10)
}
  0x5e   : > { %1282 = dma.hbm_to_vmem [thread:$0]  (!%p1774_p11), %s1770_s11, 128, %s1772_s23, %s259_s10  }
  0x5f   : > { %278 = sbr.rel (%p1677_p8) target bundleno = 902 (0x386), region = 48  ;;  %s1806_s15 = sand.u32 (!%p1677_p8), 1, %s1578_s25  }
  0x60   : > { %s1137_s14 = sshll.u32 (!%p1677_p8), %s1806_s15, 3  ;;  %s281_s20 = scalar_lea.sflag (!%p1677_p8), [#allocation3], %s1806_s15 }
  0x61   : > { %s284_s21 = scalar_lea.vmem (!%p1677_p8), [#allocation2], %s1137_s14  ;;  %p1905_p4 = scmp.ne.s32.totalorder (!%p1677_p8), %s1898_s30, 0 }
  0x66   : > { %1561 = dma.done.wait (%p1905_p4), %s281_s20, 128  }
  0x67   : > { %1563 = vsyncadd (%p1905_p4), %s281_s20, 4294967168  ;;  %p1906_p7 = scmp.eq.s32.totalorder %s1658_s28, 0 }
  0x69   : > { %1565 = dma.done.wait (%p1906_p7), [#allocation6], 8192   ;;  %p1907_p8 = pmov %p1906_p7 }
  0x6a   : > { %v1820_v0 = vld [vmem:[%s284_s21] sm:$0xff]  ;;  %v1595_v31 = vmov 0   ;;  %v1380_v48 = vld [vmem:[#allocation7 + $0x40] sm:$0xff]   ;;  %v1384_v52 = vld [vmem:[#allocation7 + $0x48] sm:$0xff]   ;;  %s1213_s16 = sshll.u32 %s1658_s28, 7  ;;  %s322_s19 = scalar_lea.vmem [#allocation8], %s1137_s14 }
  0x6b   : > { %1567 = vsyncadd (%p1907_p8), [#allocation6], 4294959104  ;;  %327 = vadd.xlane.f32.xlu0 %v1820_v0  ;;  %v1332_v1 = vld [vmem:[#allocation5 + $0x4] ss:$16 sps:$4 sm:$0xff]   ;;  %v1334_v2 = vld [vmem:[#allocation5 + $0xc] ss:$16 sps:$4 sm:$0xff]   ;;  %599 = vmatprep.mubr.bf16.mxu0 %v1595_v31  ;;  %s1843_s9 = scalar_lea.hbm %s1894_s7, %s1213_s16 }
  0x6c   : > { %v1336_v3 = vld [vmem:[#allocation5] ss:$16 sps:$4 sm:$0xff]   ;;  %v1337_v4 = vld [vmem:[#allocation5 + $0x8] ss:$16 sps:$4 sm:$0xff]   ;;  %v1338_v5 = vld [vmem:[#allocation5 + $0x24] ss:$16 sps:$4 sm:$0xff]   ;;  %567 = vmatprep.subr.bf16.mxu0 %v1332_v1  ;;  %608 = vmatprep.subr.bf16.mxu1 %v1334_v2 }
  0x6d   : > { %v1340_v6 = vld [vmem:[#allocation5 + $0x2c] ss:$16 sps:$4 sm:$0xff]   ;;  %v1342_v7 = vld [vmem:[#allocation5 + $0x20] ss:$16 sps:$4 sm:$0xff]   ;;  %v1343_v8 = vld [vmem:[#allocation5 + $0x28] ss:$16 sps:$4 sm:$0xff]   ;;  %568 = vmatpush1.bf16.msra.mxu0 %v1336_v3  ;;  %609 = vmatpush1.bf16.msra.mxu1 %v1337_v4 }
  0x6e   : > { %v1344_v9 = vld [vmem:[#allocation5 + $0x44] ss:$16 sps:$4 sm:$0xff]   ;;  %v1346_v10 = vld [vmem:[#allocation5 + $0x4c] ss:$16 sps:$4 sm:$0xff]   ;;  %569 = vmatprep.subr.bf16.mxu0 %v1338_v5  ;;  %610 = vmatprep.subr.bf16.mxu1 %v1340_v6  ;;  %v1348_v15 = vld [vmem:[#allocation5 + $0x40] ss:$16 sps:$4 sm:$0xff]  }
  0x6f   : > { %v1349_v16 = vld [vmem:[#allocation5 + $0x48] ss:$16 sps:$4 sm:$0xff]   ;;  %v1350_v17 = vld [vmem:[#allocation5 + $0x64] ss:$16 sps:$4 sm:$0xff]   ;;  %v1352_v18 = vld [vmem:[#allocation5 + $0x6c] ss:$16 sps:$4 sm:$0xff]   ;;  %640 = vmatprep.mubr.bf16.mxu1 %v1595_v31 }
  0x70   : > { %v1354_v19 = vld [vmem:[#allocation5 + $0x60] ss:$16 sps:$4 sm:$0xff]   ;;  %v1355_v20 = vld [vmem:[#allocation5 + $0x68] ss:$16 sps:$4 sm:$0xff]   ;;  %v1356_v21 = vld [vmem:[#allocation5 + $0x84] ss:$16 sps:$4 sm:$0xff]  }
  0x71   : > { %570 = vmatpush1.bf16.msra.mxu0 %v1342_v7  ;;  %611 = vmatpush1.bf16.msra.mxu1 %v1343_v8  ;;  %v1358_v22 = vld [vmem:[#allocation5 + $0x8c] ss:$16 sps:$4 sm:$0xff]   ;;  %v1360_v23 = vld [vmem:[#allocation5 + $0x80] ss:$16 sps:$4 sm:$0xff]   ;;  %v1361_v24 = vld [vmem:[#allocation5 + $0x88] ss:$16 sps:$4 sm:$0xff]  }
  0x72   : > { %571 = vmatprep.subr.bf16.mxu0 %v1344_v9  ;;  %612 = vmatprep.subr.bf16.mxu1 %v1346_v10  ;;  %v1362_v25 = vld [vmem:[#allocation5 + $0xa4] ss:$16 sps:$4 sm:$0xff]   ;;  %v1364_v26 = vld [vmem:[#allocation5 + $0xac] ss:$16 sps:$4 sm:$0xff]   ;;  %v1366_v27 = vld [vmem:[#allocation5 + $0xa0] ss:$16 sps:$4 sm:$0xff]  }
  0x73   : > { %v1367_v28 = vld [vmem:[#allocation5 + $0xa8] ss:$16 sps:$4 sm:$0xff]   ;;  %v1368_v29 = vld [vmem:[#allocation5 + $0xc4] ss:$16 sps:$4 sm:$0xff]   ;;  %v1370_v30 = vld [vmem:[#allocation5 + $0xcc] ss:$16 sps:$4 sm:$0xff]  }
  0x74   : > { %v1372_v32 = vld [vmem:[#allocation5 + $0xc0] ss:$16 sps:$4 sm:$0xff]   ;;  %v1373_v33 = vld [vmem:[#allocation5 + $0xc8] ss:$16 sps:$4 sm:$0xff]   ;;  %v1374_v34 = vld [vmem:[#allocation5 + $0xe4] ss:$16 sps:$4 sm:$0xff]  }
  0x75   : > { %572 = vmatpush1.bf16.msra.mxu0 %v1348_v15  ;;  %613 = vmatpush1.bf16.msra.mxu1 %v1349_v16  ;;  %v1376_v35 = vld [vmem:[#allocation5 + $0xec] ss:$16 sps:$4 sm:$0xff]   ;;  %v1378_v36 = vld [vmem:[#allocation5 + $0xe0] ss:$16 sps:$4 sm:$0xff]   ;;  %v1379_v37 = vld [vmem:[#allocation5 + $0xe8] ss:$16 sps:$4 sm:$0xff]  }
  0x76   : > { %573 = vmatprep.subr.bf16.mxu0 %v1350_v17  ;;  %614 = vmatprep.subr.bf16.mxu1 %v1352_v18  ;;  %v1141_v42 = vld [vmem:[%s1888_s1] ss:$0 sm:$0xff]  ;;  %v1381_v49 = vld [vmem:[#allocation7 + $0xc0] sm:$0xff]   ;;  %v1385_v53 = vld [vmem:[#allocation7 + $0xc8] sm:$0xff]   ;;  %v387_v17 = vlaneseq  ;;  %s1040_s20 = sshll.u32 %s322_s19, 4  ;;  %s1027_s11 = scalar_lea.sflag [#allocation4], %s1806_s15  ;;  %s1845_s20 = int_to_ptr.vmem [resolvable:$true] %s1040_s20 }
  0x77   : > { %v1142_v44 = vld [vmem:[%s1889_s2] ss:$0 sm:$0xff]  ;;  %v1382_v50 = vld [vmem:[#allocation7] sm:$0xff]   ;;  %v1386_v54 = vld [vmem:[#allocation7 + $0x8] sm:$0xff]   ;;  %s1516_s23 = scalar_lea.vmem %s1845_s20, 128  ;;  %p1908_p0 = scmp.ne.s32.totalorder %s1903_s18, 0 }
  0x78   : > { %v1383_v51 = vld [vmem:[#allocation7 + $0x80] sm:$0xff]   ;;  %v1387_v55 = vld [vmem:[#allocation7 + $0x88] sm:$0xff]   ;;  %v1388_v56 = vld [vmem:[#allocation7 + $0x50] sm:$0xff]   ;;  %v388_v18 = vshrl.u32 %v387_v17, 7  ;;  %p1517_p11 = scmp.ne.s32.totalorder %s1845_s20, %s1516_s23  ;;  %s1596_s28 = smov [#allocation8]  }
  0x79   : > { %574 = vmatpush1.bf16.msra.mxu0 %v1354_v19  ;;  %615 = vmatpush1.bf16.msra.mxu1 %v1355_v20  ;;  %v1389_v57 = vld [vmem:[#allocation7 + $0xd0] sm:$0xff]   ;;  %v1392_v60 = vld [vmem:[#allocation7 + $0x58] sm:$0xff]   ;;  %v1396_v1 = vld [vmem:[#allocation7 + $0x60] sm:$0xff]   ;;  %s1520_s14 = sshll.u32 %s1596_s28, 4  ;;  %s1521_s14 = int_to_ptr.vmem [resolvable:$false] %s1520_s14 }
  0x7a   : > { %575 = vmatprep.subr.bf16.mxu0 %v1356_v21  ;;  %616 = vmatprep.subr.bf16.mxu1 %v1358_v22  ;;  %v1390_v58 = vld [vmem:[#allocation7 + $0x10] sm:$0xff]   ;;  %v1393_v61 = vld [vmem:[#allocation7 + $0xd8] sm:$0xff]   ;;  %v1397_v2 = vld [vmem:[#allocation7 + $0xe0] sm:$0xff]   ;;  %v389_v19 = vsub.s32 0, %v388_v18  ;;  %v397_v20 = vsub.s32 2, %v388_v18  ;;  %v393_v22 = vsub.s32 1, %v388_v18  ;;  %p1518_p1 = pnand %p1517_p11, %p1908_p0  ;;  %p1523_p5 = scmp.lt.s32.totalorder %s1845_s20, %s1521_s14 }
  0x7b   : > { %v1391_v59 = vld [vmem:[#allocation7 + $0x90] sm:$0xff]   ;;  %v1394_v62 = vld [vmem:[#allocation7 + $0x18] sm:$0xff]   ;;  %v1398_v3 = vld [vmem:[#allocation7 + $0x20] sm:$0xff]   ;;  %s1522_s29 = scalar_lea.vmem %s1521_s14, 256 }
  0x7c   : > { %v1395_v63 = vld [vmem:[#allocation7 + $0x98] sm:$0xff]   ;;  %v1399_v4 = vld [vmem:[#allocation7 + $0xa0] sm:$0xff]   ;;  %v1400_v5 = vld [vmem:[#allocation7 + $0x68] sm:$0xff]   ;;  %p1519_p3 = pneg %p1518_p1  ;;  %p1524_p9 = scmp.lt.s32.totalorder %s1522_s29, %s1516_s23 }
  0x7d   : > { %576 = vmatpush1.bf16.msra.mxu0 %v1360_v23  ;;  %617 = vmatpush1.bf16.msra.mxu1 %v1361_v24  ;;  %v1401_v6 = vld [vmem:[#allocation7 + $0xe8] sm:$0xff]   ;;  %v1404_v9 = vld [vmem:[#allocation7 + $0x70] sm:$0xff]   ;;  %v1410_v15 = vld [vmem:[#allocation7 + $0x38] sm:$0xff]   ;;  %v401_v23 = vsub.s32 3, %v388_v18 }
  0x7e   : > { %577 = vmatprep.subr.bf16.mxu0 %v1362_v25  ;;  %618 = vmatprep.subr.bf16.mxu1 %v1364_v26  ;;  %v1402_v7 = vld [vmem:[#allocation7 + $0x28] sm:$0xff]   ;;  %v1405_v10 = vld [vmem:[#allocation7 + $0xf0] sm:$0xff]   ;;  %v1411_v16 = vld [vmem:[#allocation7 + $0xb8] sm:$0xff]   ;;  %p1525_p12 = por %p1524_p9, %p1523_p5 }
  0x7f   : > { %v1403_v8 = vld [vmem:[#allocation7 + $0xa8] sm:$0xff]   ;;  %v385_v21 = vld [vmem:[%s1891_s4] sm:$0xf] }
  0x80   : > { %v390_v24 = vrot.slane %v385_v21, %v389_v19  ;;  %v398_v25 = vrot.slane %v385_v21, %v397_v20  ;;  %v394_v26 = vrot.slane %v385_v21, %v393_v22  ;;  %p1526_p2 = pnand %p1525_p12, %p1519_p3 }
  0x81   : > { %578 = vmatpush1.bf16.msra.mxu0 %v1366_v27  ;;  %619 = vmatpush1.bf16.msra.mxu1 %v1367_v28  ;;  %v402_v27 = vrot.slane %v385_v21, %v401_v23 }
  0x82   : > { %579 = vmatprep.subr.bf16.mxu0 %v1368_v29  ;;  %620 = vmatprep.subr.bf16.mxu1 %v1370_v30 }
  0x85   : > { %580 = vmatpush1.bf16.msra.mxu0 %v1372_v32  ;;  %621 = vmatpush1.bf16.msra.mxu1 %v1373_v33 }
  0x86   : > { %581 = vmatprep.subr.bf16.mxu0 %v1374_v34  ;;  %622 = vmatprep.subr.bf16.mxu1 %v1376_v35 }
  0x89   : > { %582 = vmatpush1.bf16.msra.mxu0 %v1378_v36  ;;  %623 = vmatpush1.bf16.msra.mxu1 %v1379_v37 }
  0x8a   : > { %1216 = vmatprep.subr.bf16.mxu0 %v1380_v48  ;;  %1238 = vmatprep.subr.bf16.mxu1 %v1381_v49 }
  0xf8   : > { %v328_v11 = vpop.xlane.xlu0 %327 }
  0xf9   : > { %v329_v12 = vmul.f32 0.0078125, %v328_v11  ;;  %v1406_v11 = vld [vmem:[#allocation7 + $0x30] sm:$0xff]  }
  0xfb   : > { %v330_v13 = vsub.f32 %v1820_v0, %v329_v12  ;;  %v1407_v12 = vld [vmem:[#allocation7 + $0xb0] sm:$0xff]  }
  0xfd   : > { %v331_v14 = vmul.f32 %v330_v13, %v330_v13 }
  0xff   : > { %332 = vadd.xlane.f32.xlu0 %v331_v14  ;;  %v1409_v14 = vld [vmem:[#allocation7 + $0xf8] sm:$0xff]  }
 0x18c   : > { %v333_v38 = vpop.xlane.xlu0 %332 }
 0x18d   : > { %v334_v39 = vmul.f32 0.0078125, %v333_v38 }
 0x18f   : > { %v335_v40 = vadd.f32 1e-05, %v334_v39 }
 0x191   : > { %1412 = vrsqrt.f32 %v335_v40 }
 0x19b   : > { %v1413_v41 = vpop.eup %1412 }
 0x19c   : > { %v337_v43 = vmul.f32 %v1413_v41, %v330_v13  ;;  %v1408_v13 = vld [vmem:[#allocation7 + $0x78] sm:$0xff]  }
 0x19e   : > { %v344_v45 = vmul.f32 %v1141_v42, %v337_v43 }
 0x1a0   : > { %v351_v46 = vadd.f32 %v1142_v44, %v344_v45 }
 0x1a2   : > { %v352_v47 = vpack.c.bf16 %v351_v46, %v351_v46 }
 0x1a4   : > { %600 = vmatmul.mubr.bf16.vlgmr.msra.gmra.mrb[0].mxu0 %v352_v47  ;;  %641 = vmatmul.mubr.bf16.vlgmr.msra.gmra.mrb[0].mxu1 %v352_v47 }
 0x1a5   : > { %1217 = vmatpush3.bf16.msra.mxu0 %v1382_v50  ;;  %1239 = vmatpush3.bf16.msra.mxu1 %v1383_v51 }
 0x1a6   : > { %1218 = vmatprep.subr.bf16.mxu0 %v1384_v52  ;;  %1240 = vmatprep.subr.bf16.mxu1 %v1385_v53 }
 0x1a9   : > { %1219 = vmatpush3.bf16.msra.mxu0 %v1386_v54  ;;  %1241 = vmatpush3.bf16.msra.mxu1 %v1387_v55 }
 0x1aa   : > { %1220 = vmatprep.subr.bf16.mxu0 %v1388_v56  ;;  %1242 = vmatprep.subr.bf16.mxu1 %v1389_v57 }
 0x1ad   : > { %1221 = vmatpush3.bf16.msra.mxu0 %v1390_v58  ;;  %1243 = vmatpush3.bf16.msra.mxu1 %v1391_v59 }
 0x1ae   : > { %1222 = vmatprep.subr.bf16.mxu0 %v1392_v60  ;;  %1244 = vmatprep.subr.bf16.mxu1 %v1393_v61 }
 0x1b1   : > { %1223 = vmatpush3.bf16.msra.mxu0 %v1394_v62  ;;  %1245 = vmatpush3.bf16.msra.mxu1 %v1395_v63 }
 0x1b2   : > { %1224 = vmatprep.subr.bf16.mxu0 %v1396_v1  ;;  %1246 = vmatprep.subr.bf16.mxu1 %v1397_v2 }
 0x1b5   : > { %1225 = vmatpush3.bf16.msra.mxu0 %v1398_v3  ;;  %1247 = vmatpush3.bf16.msra.mxu1 %v1399_v4  ;;  %v1179_v3 = vld [vmem:[%s1893_s6] ss:$0 sm:$0xff] }
 0x1b6   : > { %1226 = vmatprep.subr.bf16.mxu0 %v1400_v5  ;;  %1248 = vmatprep.subr.bf16.mxu1 %v1401_v6 }
 0x1b9   : > { %1227 = vmatpush3.bf16.msra.mxu0 %v1402_v7  ;;  %1249 = vmatpush3.bf16.msra.mxu1 %v1403_v8 }
 0x1ba   : > { %1228 = vmatprep.subr.bf16.mxu0 %v1404_v9  ;;  %1250 = vmatprep.subr.bf16.mxu1 %v1405_v10 }
 0x1bd   : > { %1229 = vmatpush3.bf16.msra.mxu0 %v1406_v11  ;;  %1251 = vmatpush3.bf16.msra.mxu1 %v1407_v12 }
 0x1be   : > { %1230 = vmatprep.subr.bf16.mxu0 %v1408_v13  ;;  %1252 = vmatprep.subr.bf16.mxu1 %v1409_v14 }
 0x1c1   : > { %1231 = vmatpush3.bf16.msra.mxu0 %v1410_v15  ;;  %1253 = vmatpush3.bf16.msra.mxu1 %v1411_v16 }
 0x277   : > { %v601_v28 = vpop.f32.mrb[0].mxu0  ;;  %v642_v29 = vpop.f32.mrb[0].mxu1 }
 0x278   : > { %v602_v30 = vadd.f32 %v601_v28, %v390_v24  ;;  %v643_v31 = vadd.f32 %v642_v29, %v398_v25  ;;  %v603_v32 = vpop.f32.mrb[1].mxu0  ;;  %v644_v33 = vpop.f32.mrb[1].mxu1 }
 0x279   : > { %v604_v34 = vadd.f32 %v603_v32, %v394_v26  ;;  %v645_v35 = vadd.f32 %v644_v33, %v402_v27  ;;  %v605_v36 = vpop.f32.mrb[2].mxu0  ;;  %v646_v37 = vpop.f32.mrb[2].mxu1 }
 0x27a   : > { %v1175_v38 = vmul.f32 -1.442695, %v602_v30  ;;  %v1177_v39 = vmul.f32 -1.442695, %v643_v31  ;;  %v606_v40 = vpop.f32.mrb[3].mxu0  ;;  %v647_v41 = vpop.f32.mrb[3].mxu1 }
 0x27b   : > { %v1176_v42 = vmul.f32 -1.442695, %v604_v34  ;;  %v1178_v43 = vmul.f32 -1.442695, %v645_v35 }
 0x27c   : > { %1414 = vpow2.f32 %v1175_v38 }
 0x27d   : > { %1416 = vpow2.f32 %v1177_v39 }
 0x27e   : > { %1418 = vpow2.f32 %v1176_v42 }
 0x27f   : > { %1420 = vpow2.f32 %v1178_v43 }
 0x286   : > { %v1415_v44 = vpop.eup %1414 }
 0x287   : > { %v1417_v45 = vpop.eup %1416  ;;  %v661_v46 = vadd.f32 1.0, %v1415_v44 }
 0x288   : > { %v1419_v47 = vpop.eup %1418  ;;  %v663_v48 = vadd.f32 1.0, %v1417_v45 }
 0x289   : > { %v1421_v49 = vpop.eup %1420  ;;  %1422 = vrcp.f32 %v661_v46  ;;  %v662_v50 = vadd.f32 1.0, %v1419_v47 }
 0x28a   : > { %1424 = vrcp.f32 %v663_v48  ;;  %v664_v51 = vadd.f32 1.0, %v1421_v49 }
 0x28b   : > { %1426 = vrcp.f32 %v662_v50 }
 0x28c   : > { %1428 = vrcp.f32 %v664_v51 }
 0x293   : > { %v1423_v52 = vpop.eup %1422 }
 0x294   : > { %v1425_v53 = vpop.eup %1424  ;;  %v673_v55 = vmul.f32 %v1423_v52, %v602_v30 }
 0x295   : > { %v1427_v54 = vpop.eup %1426  ;;  %v675_v57 = vmul.f32 %v1425_v53, %v643_v31 }
 0x296   : > { %v1429_v56 = vpop.eup %1428  ;;  %v674_v58 = vmul.f32 %v1427_v54, %v604_v34  ;;  %v677_v61 = vpack.c.bf16 %v673_v55, %v673_v55 }
 0x297   : > { %v676_v59 = vmul.f32 %v1429_v56, %v645_v35  ;;  %v679_v63 = vpack.c.bf16 %v675_v57, %v675_v57 }
 0x298   : > { %v678_v60 = vpack.c.bf16 %v674_v58, %v674_v58 }
 0x299   : > { %v680_v62 = vpack.c.bf16 %v676_v59, %v676_v59 }
 0x29a   : > { %976 = vmatprep.mubr.bf16.mxu0 %v678_v60 }
 0x29b   : > { %1016 = vmatprep.mubr.bf16.mxu1 %v680_v62  ;;  %977 = vmatmul.mubr.bf16.vlgmr.msra.gmra.mrb[4].mxu0 %v677_v61 }
 0x29c   : > { %1017 = vmatmul.mubr.bf16.vlgmr.msra.gmra.mrb[4].mxu1 %v679_v63 }
 0x36e   : > { %v1232_v1 = vpop.f32.mrb[4].mxu0 }
 0x36f   : > { %v1254_v2 = vpop.f32.mrb[4].mxu1  ;;  %v1233_v4 = vpop.f32.mrb[5].mxu0 }
 0x370   : > { %v1234_v5 = vadd.f32 %v1233_v4, %v1232_v1  ;;  %v1255_v6 = vpop.f32.mrb[5].mxu1  ;;  %v1235_v7 = vpop.f32.mrb[6].mxu0 }
 0x371   : > { %v1256_v8 = vadd.f32 %v1255_v6, %v1254_v2  ;;  %v1257_v9 = vpop.f32.mrb[6].mxu1  ;;  %v1236_v10 = vpop.f32.mrb[7].mxu0 }
 0x372   : > { %v979_v11 = vadd.f32 %v1234_v5, %v1179_v3  ;;  %v1258_v12 = vpop.f32.mrb[7].mxu1 }
 0x374   : > { %v1019_v13 = vadd.f32 %v1256_v8, %v979_v11 }
 0x376   : > { %v1024_v14 = vadd.f32 %v1019_v13, %v1820_v0 }
 0x378   : > { %1025 = vst [vmem:[%s322_s19] sm:$0xff] %v1024_v14 }
 0x379   : > { %1529 = shalt.err (!%p1526_p2)
}
 0x37a   : > { %s1530_s15 = scalar_lea.hbm %s1843_s9, 128  ;;  %s1534_s22 = scalar_lea.hbm %s1894_s7, 256 }
 0x37b   : > { %p1531_p13 = scmp.ne.s32.totalorder %s1843_s9, %s1530_s15  ;;  %p1535_p4 = scmp.lt.u32.totalorder %s1843_s9, %s1894_s7 }
 0x37c   : > { %p1536_p7 = scmp.lt.u32.totalorder %s1534_s22, %s1530_s15  ;;  %p1538_p11 = scmp.lt.u32.totalorder %s1530_s15, %s1843_s9 }
 0x37d   : > { %p1532_p6 = pnand %p1531_p13, %p1908_p0 }
 0x37e   : > { %p1537_p8 = por %p1536_p7, %p1535_p4 }
 0x37f   : > { %p1533_p10 = pneg %p1532_p6 }
 0x380   : > { %p1539_p1 = por %p1538_p11, %p1537_p8 }
 0x382   : > { %p1540_p3 = pnand %p1539_p1, %p1533_p10 }
 0x384   : > { %1543 = shalt.err (!%p1540_p3)
}
 0x385   : > { %1270 = dma.vmem_to_hbm [thread:$0]  (%p1908_p0), %s1845_s20, 128, %s1843_s9, %s1027_s11  }
 0x386 PF: > { %s1052_s21 = sand.u32 1, %s1574_s24   ;;  %p1909_p5 = scmp.ne.s32.totalorder %s1899_s8, 0 }
 0x387   : > { %p1910_p9 = scmp.ge.s32.totalorder %s1586_s27, 2  ;;  %s1053_s30 = scalar_lea.sflag [#allocation4], %s1052_s21 }
 0x389   : > { %p1284_p12 = pnand %p1910_p9, %p1909_p5 }
 0x38b   : > { %1569 = dma.done.wait (!%p1284_p12), %s1053_s30, 128  }
 0x38c   : > { %1571 = vsyncadd (!%p1284_p12), %s1053_s30, 4294967168  ;;  %p21_p2 = scmp.ge.s32.totalorder %s1747_s13, 4   ;;  %s1911_s24 = smov %s1578_s25 }
 0x38d   : > { %s1912_s25 = smov %s1582_s26  ;;  %s1913_s26 = smov %s1756_s17 }
 0x38e   : > { %s1914_s27 = smov %s1747_s13  ;;  %23 = sbr.rel (!%p21_p2) target bundleno = 6 (0x6), region = 101 }
 0x395   :  { %1058 = vsyncpa [#allocation3], 1 }
 0x396   :  { %1060 = vsyncpa [#allocation3 + $0x1], 1 }
 0x397   :  { %1061 = vsyncpa [#allocation6], 1 }
 0x398   :  { %1062 = vsyncpa [#allocation4], 1 }
 0x399   :  { %1064 = vsyncpa [#allocation4 + $0x1], 1 }

</bundles_post_ra>
